<compile_context>
chip_gen: v6e
topology: v6e:2x2x1
jax: 0.10.0
libtpu: 0.0.40
codegen_flags: <defaults>
</compile_context>

<pallas_src>
import functools
import math

import jax
import jax.numpy as jnp
from jax import lax
from jax.experimental import pallas as pl
from jax.experimental.pallas import tpu as pltpu

_LN_EPS = 1e-5
_INV_SQRT2 = 0.7071067811865476
_NEG_BIG = -1e30


def _layer_norm(x, gamma, beta):
    mu = jnp.mean(x, axis=-1, keepdims=True)
    var = jnp.mean(jnp.square(x - mu), axis=-1, keepdims=True)
    return (x - mu) * lax.rsqrt(var + _LN_EPS) * gamma + beta


def _round_up(x, m):
    return (x + m - 1) // m * m


def _vmem_limit_bytes():
    cap = 64 * 1024 * 1024
    try:
        cap = int(pltpu.get_tpu_info().vmem_capacity_bytes)
    except Exception:
        pass
    # ~75% of physical VMEM: ~96 MB on v5e/v6e (128 MiB), ~48 MB on v7x (64 MiB)
    return max(32 * 1024 * 1024, min(cap * 3 // 4, 100 * 1024 * 1024))


# --------------------------------------------------------------------------- #
# Kernel 1: LN1 + fused Q/K/V projection (per batch, per sequence tile)       #
# --------------------------------------------------------------------------- #
def _qkv_kernel(h_ref, g_ref, b_ref, wq_ref, bq_ref, wk_ref, wv_ref, bv_ref,
                q_ref, k_ref, v_ref, *, compute_dtype):
    cd = compute_dtype
    xn = _layer_norm(h_ref[0], g_ref[0], b_ref[0]).astype(cd)
    q = jnp.dot(xn, wq_ref[...], preferred_element_type=jnp.float32) + bq_ref[0]
    k = jnp.dot(xn, wk_ref[...], preferred_element_type=jnp.float32)
    v = jnp.dot(xn, wv_ref[...], preferred_element_type=jnp.float32) + bv_ref[0]
    q_ref[0] = q.astype(q_ref.dtype)      # head scale pre-folded into wq / bq
    k_ref[0] = k.astype(k_ref.dtype)
    v_ref[0] = v.astype(v_ref.dtype)


# --------------------------------------------------------------------------- #
# Kernel 2: flash attention (head-batched) + out_proj + first residual        #
# --------------------------------------------------------------------------- #
def _attn_kernel(h_ref, q_ref, k_ref, v_ref, *rest, num_heads, head_dim,
                 has_mask, seq_len, block_k, padded, compute_dtype):
    if has_mask:
        mask_ref, rest = rest[0], rest[1:]           # (1, 1, TQ, TK) additive
    else:
        mask_ref = None
    (hm_ref,                                         # (H,) in SMEM
     wo_ref, bo_ref,                                 # (D, D), (1, D)
     o_ref,                                          # (1, TQ, D)
     m_scr, l_scr,                                   # (H, TQ, 1) f32
     acc_scr,                                        # (H, TQ, hd) f32
     ) = rest

    cd = compute_dtype
    ki = pl.program_id(2)
    n_kv = pl.num_programs(2)

    @pl.when(ki == 0)
    def _init():
        m_scr[...] = jnp.full_like(m_scr, _NEG_BIG)
        l_scr[...] = jnp.zeros_like(l_scr)
        acc_scr[...] = jnp.zeros_like(acc_scr)

    q3 = q_ref[0]                                    # (H, TQ, hd) compute_dtype
    k3 = k_ref[0]                                    # (H, TK, hd)
    v3 = v_ref[0]                                    # (H, TK, hd)

    # One batched MXU push across all heads (back-to-back issues).
    s = jnp.einsum("hqd,hkd->hqk", q3, k3,
                   preferred_element_type=jnp.float32)        # (H, TQ, TK)
    if has_mask:
        s = s + mask_ref[0]                          # (1, TQ, TK) broadcast
    if padded:                                       # mask padded key columns
        col = ki * block_k + lax.broadcasted_iota(jnp.int32, (1, 1, block_k), 2)
        s = jnp.where(col < seq_len, s, _NEG_BIG)

    m_prev = m_scr[...]
    m_new = jnp.maximum(m_prev, jnp.max(s, axis=-1, keepdims=True))
    alpha = jnp.exp(m_prev - m_new)
    p = jnp.exp(s - m_new)
    l_scr[...] = alpha * l_scr[...] + jnp.sum(p, axis=-1, keepdims=True)
    acc_scr[...] = alpha * acc_scr[...] + jnp.einsum(
        "hqk,hkd->hqd", p.astype(cd), v3, preferred_element_type=jnp.float32)
    m_scr[...] = m_new

    @pl.when(ki == n_kv - 1)
    def _finalize():
        # Guard fully-masked rows (l == 0) before the (exact) reciprocal.
        inv_l = 1.0 / jnp.maximum(l_scr[...], 1e-30)          # (H, TQ, 1)
        tq = acc_scr.shape[1]
        out = jnp.zeros((tq, num_heads * head_dim), jnp.float32)
        for h in range(num_heads):                   # static unroll, finalize only
            ctx_h = acc_scr[h] * (inv_l[h] * hm_ref[h])       # post-softmax head mask
            out = out + jnp.dot(
                ctx_h.astype(cd), wo_ref[h * head_dim:(h + 1) * head_dim, :],
                preferred_element_type=jnp.float32)
        o_ref[0] = (h_ref[0] + out + bo_ref[0]).astype(o_ref.dtype)


# --------------------------------------------------------------------------- #
# Kernel 3: LN2 + fc1 + GELU + fc2 + second residual (FFN dim streamed)       #
# --------------------------------------------------------------------------- #
def _ffn_kernel(h_ref, g_ref, b_ref, w1_ref, b1_ref, w2_ref, b2_ref, o_ref,
                xn_scr, acc_scr, *, compute_dtype):
    cd = compute_dtype
    fi = pl.program_id(2)
    n_f = pl.num_programs(2)

    @pl.when(fi == 0)
    def _init():
        xn_scr[...] = _layer_norm(h_ref[0], g_ref[0], b_ref[0]).astype(cd)
        acc_scr[...] = jnp.zeros_like(acc_scr)

    f = jnp.dot(xn_scr[...], w1_ref[...],
                preferred_element_type=jnp.float32) + b1_ref[0]
    f = 0.5 * f * (1.0 + lax.erf(f * _INV_SQRT2))             # exact GELU
    acc_scr[...] += jnp.dot(f.astype(cd), w2_ref[...],
                            preferred_element_type=jnp.float32)

    @pl.when(fi == n_f - 1)
    def _finalize():
        o_ref[0] = (h_ref[0] + acc_scr[...] + b2_ref[0]).astype(o_ref.dtype)


# --------------------------------------------------------------------------- #
# Wrapper                                                                      #
# --------------------------------------------------------------------------- #
def whisper_encoder_layer(hidden, attn_mask, head_mask, params, num_heads,
                          *, block_q=128, block_k=256, block_f=512,
                          compute_dtype=jnp.bfloat16):
    B, S, D = hidden.shape
    F = params["w1"].shape[1]
    head_dim = D // num_heads
    assert num_heads * head_dim == D
    has_mask = attn_mask is not None
    if head_mask is None:
        head_mask = jnp.ones((num_heads,), jnp.float32)

    # --- sequence padding: S -> s_pad, a multiple of every sequence tile -----
    s128 = _round_up(S, 128)
    block_q = min(block_q, s128)
    block_k = min(block_k, s128)
    s_pad = _round_up(S, math.lcm(block_q, block_k))
    padded = s_pad != S
    n_q, n_kv = s_pad // block_q, s_pad // block_k
    n_s = s_pad // block_q
    if F % block_f != 0:
        block_f = F                       # Whisper FFN dims are multiples of 512
    n_f = F // block_f

    cd = compute_dtype
    scale = head_dim ** -0.5
    wq = (params["wq"] * scale).astype(cd)          # fold head scaling into q_proj
    bq = params["bq"] * scale

    def mm(w):                                      # MXU operands in compute_dtype
        return w.astype(cd)

    hid = hidden
    if padded:
        hid = jnp.pad(hid, ((0, 0), (0, s_pad - S), (0, 0)))
    vmem = _vmem_limit_bytes()

    # ---------------- kernel 1: LN1 + fused Q/K/V projection -----------------
    def rep2(shape):
        return pl.BlockSpec(shape, lambda b, si: (0,) * len(shape))

    seq_spec2 = pl.BlockSpec((1, block_q, D), lambda b, si: (b, si, 0))
    q, k, v = pl.pallas_call(
        functools.partial(_qkv_kernel, compute_dtype=cd),
        out_shape=tuple(jax.ShapeDtypeStruct((B, s_pad, D), cd) for _ in range(3)),
        grid=(B, n_s),
        in_specs=[
            seq_spec2,                                # hidden tile
            rep2((1, D)), rep2((1, D)),               # ln1 g / b
            rep2((D, D)), rep2((1, D)),               # q_proj (scaled)
            rep2((D, D)),                             # k_proj (no bias)
            rep2((D, D)), rep2((1, D)),               # v_proj
        ],
        out_specs=tuple(pl.BlockSpec((1, block_q, D), lambda b, si: (b, si, 0))
                        for _ in range(3)),
        compiler_params=pltpu.CompilerParams(
            dimension_semantics=("parallel", "parallel"),
            vmem_limit_bytes=vmem),
    )(hid, params["ln1_g"], params["ln1_b"], wq, bq,
      mm(params["wk"]), mm(params["wv"]), params["bv"])

    # head-major layout for batched-head attention (plain XLA transpose)
    def to_heads(x):
        return x.reshape(B, s_pad, num_heads, head_dim).transpose(0, 2, 1, 3)
    q, k, v = to_heads(q), to_heads(k), to_heads(v)

    # ---------------- kernel 2: flash attention + out_proj + residual --------
    attn_kernel = functools.partial(
        _attn_kernel, num_heads=num_heads, head_dim=head_dim, has_mask=has_mask,
        seq_len=S, block_k=block_k, padded=padded, compute_dtype=cd)

    def rep3(shape):
        return pl.BlockSpec(shape, lambda b, qi, ki: (0,) * len(shape))

    in_specs = [
        pl.BlockSpec((1, block_q, D), lambda b, qi, ki: (b, qi, 0)),           # residual
        pl.BlockSpec((1, num_heads, block_q, head_dim),
                     lambda b, qi, ki: (b, 0, qi, 0)),                         # Q
        pl.BlockSpec((1, num_heads, block_k, head_dim),
                     lambda b, qi, ki: (b, 0, ki, 0)),                         # K
        pl.BlockSpec((1, num_heads, block_k, head_dim),
                     lambda b, qi, ki: (b, 0, ki, 0)),                         # V
    ]
    args = [hid, q, k, v]
    if has_mask:                         # mask DMA'd per (TQ, TK) tile only
        mask = attn_mask
        if padded:
            mask = jnp.pad(mask, ((0, 0), (0, 0),
                                  (0, s_pad - S), (0, s_pad - S)))
        in_specs.append(pl.BlockSpec((1, 1, block_q, block_k),
                                     lambda b, qi, ki: (b, 0, qi, ki)))
        args.append(mask)
    in_specs += [
        pl.BlockSpec(memory_space=pltpu.MemorySpace.SMEM),                     # head mask
        rep3((D, D)), rep3((1, D)),                                            # out_proj
    ]
    args += [head_mask.astype(jnp.float32), mm(params["wo"]), params["bo"]]

    h1 = pl.pallas_call(
        attn_kernel,
        out_shape=jax.ShapeDtypeStruct((B, s_pad, D), hidden.dtype),
        grid=(B, n_q, n_kv),
        in_specs=in_specs,
        out_specs=pl.BlockSpec((1, block_q, D), lambda b, qi, ki: (b, qi, 0)),
        scratch_shapes=[
            pltpu.VMEM((num_heads, block_q, 1), jnp.float32),        # running max
            pltpu.VMEM((num_heads, block_q, 1), jnp.float32),        # running sum
            pltpu.VMEM((num_heads, block_q, head_dim), jnp.float32), # context acc
        ],
        compiler_params=pltpu.CompilerParams(
            dimension_semantics=("parallel", "parallel", "arbitrary"),
            vmem_limit_bytes=vmem),
    )(*args)

    # ---------------- kernel 3: LN2 + FFN (streamed over F tiles) ------------
    def rep3f(shape):
        return pl.BlockSpec(shape, lambda b, si, f: (0,) * len(shape))

    out = pl.pallas_call(
        functools.partial(_ffn_kernel, compute_dtype=cd),
        out_shape=jax.ShapeDtypeStruct((B, s_pad, D), hidden.dtype),
        grid=(B, n_s, n_f),
        in_specs=[
            pl.BlockSpec((1, block_q, D), lambda b, si, f: (b, si, 0)),        # h1 tile
            rep3f((1, D)), rep3f((1, D)),                                      # ln2 g / b
            pl.BlockSpec((D, block_f), lambda b, si, f: (0, f)),               # fc1 W tile
            pl.BlockSpec((1, block_f), lambda b, si, f: (0, f)),               # fc1 b tile
            pl.BlockSpec((block_f, D), lambda b, si, f: (f, 0)),               # fc2 W tile
            rep3f((1, D)),                                                     # fc2 b
        ],
        out_specs=pl.BlockSpec((1, block_q, D), lambda b, si, f: (b, si, 0)),
        scratch_shapes=[
            pltpu.VMEM((block_q, D), cd),            # LN2 output (reused per F tile)
            pltpu.VMEM((block_q, D), jnp.float32),   # fc2 accumulator
        ],
        compiler_params=pltpu.CompilerParams(
            dimension_semantics=("parallel", "parallel", "arbitrary"),
            vmem_limit_bytes=vmem),
    )(h1, params["ln2_g"], params["ln2_b"], mm(params["w1"]), params["b1"],
      mm(params["w2"]), params["b2"])

    if padded:
        out = out[:, :S, :]
    return out


# --------------------------------------------------------------------------- #
# Pure-JAX reference of the same forward pass (HF WhisperEncoderLayer)         #
# --------------------------------------------------------------------------- #
def reference(hidden, attn_mask, head_mask, params, num_heads):
    B, S, D = hidden.shape
    hd = D // num_heads

    def ln(x, g, b):
        mu = jnp.mean(x, -1, keepdims=True)
        var = jnp.mean((x - mu) ** 2, -1, keepdims=True)
        return (x - mu) / jnp.sqrt(var + _LN_EPS) * g + b

    x = hidden
    xn = ln(x, params["ln1_g"][0], params["ln1_b"][0])
    q = (xn @ params["wq"] + params["bq"][0]) * hd ** -0.5
    k = xn @ params["wk"]
    v = xn @ params["wv"] + params["bv"][0]
    q = q.reshape(B, S, num_heads, hd).transpose(0, 2, 1, 3)
    k = k.reshape(B, S, num_heads, hd).transpose(0, 2, 1, 3)
    v = v.reshape(B, S, num_heads, hd).transpose(0, 2, 1, 3)
    s = jnp.einsum("bhqd,bhkd->bhqk", q, k)
    if attn_mask is not None:
        s = s + attn_mask
    p = jax.nn.softmax(s, axis=-1) * head_mask[None, :, None, None]
    ctx = jnp.einsum("bhqk,bhkd->bhqd", p, v).transpose(0, 2, 1, 3).reshape(B, S, D)
    h1 = x + (ctx @ params["wo"] + params["bo"][0])
    h1n = ln(h1, params["ln2_g"][0], params["ln2_b"][0])
    f = h1n @ params["w1"] + params["b1"][0]
    f = 0.5 * f * (1.0 + lax.erf(f * _INV_SQRT2))
    return h1 + (f @ params["w2"] + params["b2"][0])


if __name__ == "__main__":
    # S=200 is NOT a multiple of the tiles -> exercises padding (200 -> 256),
    # 2 q tiles, a key-validity mask and FFN streaming (block_f=128, n_f=2).
    B, S, D, H, FFN = 2, 200, 64, 4, 256

    key = jax.random.PRNGKey(0)
    ks = jax.random.split(key, 16)

    hidden = jax.random.normal(ks[0], (B, S, D), jnp.float32)
    mask_bits = jax.random.bernoulli(ks[1], 0.2, (B, 1, S, S))
    attn_mask = jnp.where(mask_bits, -1e4, 0.0).astype(jnp.float32)
    head_mask = jax.random.uniform(ks[2], (H,), jnp.float32, 0.5, 1.0)

    def w(k_, shape, std=0.05):
        return std * jax.random.normal(k_, shape, jnp.float32)

    params = {
        "ln1_g": jnp.ones((1, D), jnp.float32),
        "ln1_b": jnp.zeros((1, D), jnp.float32),
        "wq": w(ks[3], (D, D)), "bq": w(ks[4], (1, D)),
        "wk": w(ks[5], (D, D)),
        "wv": w(ks[6], (D, D)), "bv": w(ks[7], (1, D)),
        "wo": w(ks[8], (D, D)), "bo": w(ks[9], (1, D)),
        "ln2_g": jnp.ones((1, D), jnp.float32),
        "ln2_b": jnp.zeros((1, D), jnp.float32),
        "w1": w(ks[10], (D, FFN)), "b1": w(ks[11], (1, FFN)),
        "w2": w(ks[12], (FFN, D)), "b2": w(ks[13], (1, D)),
    }

    ref = reference(hidden, attn_mask, head_mask, params, H)

    # f32 compute path: strict parity check (also exercises S padding).
    out_f32 = whisper_encoder_layer(hidden, attn_mask, head_mask, params, H,
                                    block_f=128, compute_dtype=jnp.float32)
    out_f32 = jax.block_until_ready(out_f32)
    assert out_f32.shape == (B, S, D) and out_f32.dtype == jnp.float32
    assert jnp.allclose(out_f32, ref, atol=2e-3, rtol=2e-3), \
        float(jnp.max(jnp.abs(out_f32 - ref)))

    # bf16 production path (bf16 MXU operands / weights, f32 accumulation).
    out_bf16 = whisper_encoder_layer(hidden, attn_mask, head_mask, params, H,
                                     block_f=128)
    out_bf16 = jax.block_until_ready(out_bf16)
    assert out_bf16.shape == (B, S, D)
    assert bool(jnp.all(jnp.isfinite(out_bf16)))
    assert float(jnp.max(jnp.abs(out_bf16 - ref))) < 0.1

    # Typical Whisper-encoder call: attention_mask=None, divisible S, defaults.
    S2 = 256
    hidden2 = jax.random.normal(ks[14], (B, S2, D), jnp.float32)
    ref2 = reference(hidden2, None, jnp.ones((H,), jnp.float32), params, H)
    out2 = whisper_encoder_layer(hidden2, None, None, params, H)
    out2 = jax.block_until_ready(out2)
    assert out2.shape == (B, S2, D)
    assert float(jnp.max(jnp.abs(out2 - ref2))) < 0.1

    print("KERNEL_OK")
</pallas_src>

<mosaic_0001>
module attributes {stable_mosaic.version = 11 : i64} {
  func.func @_qkv_kernel(%arg0: i32, %arg1: i32, %arg2: memref<1x128x64xf32, #tpu.memory_space<vmem>>, %arg3: memref<1x64xf32, #tpu.memory_space<vmem>>, %arg4: memref<1x64xf32, #tpu.memory_space<vmem>>, %arg5: memref<64x64xf32, #tpu.memory_space<vmem>>, %arg6: memref<1x64xf32, #tpu.memory_space<vmem>>, %arg7: memref<64x64xf32, #tpu.memory_space<vmem>>, %arg8: memref<64x64xf32, #tpu.memory_space<vmem>>, %arg9: memref<1x64xf32, #tpu.memory_space<vmem>>, %arg10: memref<1x128x64xf32, #tpu.memory_space<vmem>>, %arg11: memref<1x128x64xf32, #tpu.memory_space<vmem>>, %arg12: memref<1x128x64xf32, #tpu.memory_space<vmem>>) attributes {dimension_semantics = [#tpu.dimension_semantics<parallel>, #tpu.dimension_semantics<parallel>], iteration_bounds = array<i64: 2, 2>, scalar_prefetch = 0 : i64, scratch_operands = 0 : i64, tpu.core_type = #tpu.core_type<tc>, window_params = [{transform_indices = @transform_0, window_bounds = array<i64: 1, 128, 64>}, {pipeline_mode = #tpu.pipeline_mode<synchronous>, transform_indices = @transform_1, window_bounds = array<i64: 1, 64>}, {pipeline_mode = #tpu.pipeline_mode<synchronous>, transform_indices = @transform_2, window_bounds = array<i64: 1, 64>}, {pipeline_mode = #tpu.pipeline_mode<synchronous>, transform_indices = @transform_3, window_bounds = array<i64: 64, 64>}, {pipeline_mode = #tpu.pipeline_mode<synchronous>, transform_indices = @transform_4, window_bounds = array<i64: 1, 64>}, {pipeline_mode = #tpu.pipeline_mode<synchronous>, transform_indices = @transform_5, window_bounds = array<i64: 64, 64>}, {pipeline_mode = #tpu.pipeline_mode<synchronous>, transform_indices = @transform_6, window_bounds = array<i64: 64, 64>}, {pipeline_mode = #tpu.pipeline_mode<synchronous>, transform_indices = @transform_7, window_bounds = array<i64: 1, 64>}, {transform_indices = @transform_8, window_bounds = array<i64: 1, 128, 64>}, {transform_indices = @transform_9, window_bounds = array<i64: 1, 128, 64>}, {transform_indices = @transform_10, window_bounds = array<i64: 1, 128, 64>}]} {
    %c0 = arith.constant 0 : index
    %c0_0 = arith.constant 0 : index
    %c0_1 = arith.constant 0 : index
    %0 = vector.load %arg2[%c0, %c0_0, %c0_1] : memref<1x128x64xf32, #tpu.memory_space<vmem>>, vector<1x128x64xf32>
    %1 = vector.shape_cast %0 : vector<1x128x64xf32> to vector<128x64xf32>
    %c0_2 = arith.constant 0 : index
    %c0_3 = arith.constant 0 : index
    %2 = vector.load %arg3[%c0_2, %c0_3] : memref<1x64xf32, #tpu.memory_space<vmem>>, vector<1x64xf32>
    %3 = vector.shape_cast %2 : vector<1x64xf32> to vector<64xf32>
    %c0_4 = arith.constant 0 : index
    %c0_5 = arith.constant 0 : index
    %4 = vector.load %arg4[%c0_4, %c0_5] : memref<1x64xf32, #tpu.memory_space<vmem>>, vector<1x64xf32>
    %5 = vector.shape_cast %4 : vector<1x64xf32> to vector<64xf32>
    %cst = arith.constant dense<0.000000e+00> : vector<128xf32>
    %6 = vector.multi_reduction <add>, %1, %cst [1] : vector<128x64xf32> to vector<128xf32>
    %7 = vector.shape_cast %6 : vector<128xf32> to vector<128x1xf32>
    %cst_6 = arith.constant 6.400000e+01 : f32
    %8 = vector.broadcast %cst_6 : f32 to vector<128x1xf32>
    %9 = arith.divf %7, %8 : vector<128x1xf32>
    %10 = vector.broadcast %9 : vector<128x1xf32> to vector<128x64xf32>
    %11 = arith.subf %1, %10 : vector<128x64xf32>
    %12 = arith.mulf %11, %11 : vector<128x64xf32>
    %cst_7 = arith.constant dense<0.000000e+00> : vector<128xf32>
    %13 = vector.multi_reduction <add>, %12, %cst_7 [1] : vector<128x64xf32> to vector<128xf32>
    %14 = vector.shape_cast %13 : vector<128xf32> to vector<128x1xf32>
    %cst_8 = arith.constant 6.400000e+01 : f32
    %15 = vector.broadcast %cst_8 : f32 to vector<128x1xf32>
    %16 = arith.divf %14, %15 : vector<128x1xf32>
    %17 = vector.broadcast %9 : vector<128x1xf32> to vector<128x64xf32>
    %18 = arith.subf %1, %17 : vector<128x64xf32>
    %cst_9 = arith.constant 9.99999974E-6 : f32
    %19 = vector.broadcast %cst_9 : f32 to vector<128x1xf32>
    %20 = arith.addf %16, %19 : vector<128x1xf32>
    %21 = math.rsqrt %20 : vector<128x1xf32>
    %22 = vector.broadcast %21 : vector<128x1xf32> to vector<128x64xf32>
    %23 = arith.mulf %18, %22 : vector<128x64xf32>
    %24 = vector.shape_cast %3 : vector<64xf32> to vector<1x64xf32>
    %25 = vector.broadcast %24 : vector<1x64xf32> to vector<128x64xf32>
    %26 = arith.mulf %23, %25 : vector<128x64xf32>
    %27 = vector.shape_cast %5 : vector<64xf32> to vector<1x64xf32>
    %28 = vector.broadcast %27 : vector<1x64xf32> to vector<128x64xf32>
    %29 = arith.addf %26, %28 : vector<128x64xf32>
    %c0_10 = arith.constant 0 : index
    %c0_11 = arith.constant 0 : index
    %30 = vector.load %arg5[%c0_10, %c0_11] : memref<64x64xf32, #tpu.memory_space<vmem>>, vector<64x64xf32>
    %cst_12 = arith.constant dense<0.000000e+00> : vector<128x64xf32>
    %31 = tpu.matmul %29, %30, %cst_12 {dimension_numbers = #tpu.dot_dimension_numbers<[1], [0], [0], [1], [0, 0, 1, 1], [], []>} : vector<128x64xf32>, vector<64x64xf32>, vector<128x64xf32> -> vector<128x64xf32>
    %c0_13 = arith.constant 0 : index
    %c0_14 = arith.constant 0 : index
    %32 = vector.load %arg6[%c0_13, %c0_14] : memref<1x64xf32, #tpu.memory_space<vmem>>, vector<1x64xf32>
    %33 = vector.shape_cast %32 : vector<1x64xf32> to vector<64xf32>
    %34 = vector.shape_cast %33 : vector<64xf32> to vector<1x64xf32>
    %35 = vector.broadcast %34 : vector<1x64xf32> to vector<128x64xf32>
    %36 = arith.addf %31, %35 : vector<128x64xf32>
    %c0_15 = arith.constant 0 : index
    %c0_16 = arith.constant 0 : index
    %37 = vector.load %arg7[%c0_15, %c0_16] : memref<64x64xf32, #tpu.memory_space<vmem>>, vector<64x64xf32>
    %cst_17 = arith.constant dense<0.000000e+00> : vector<128x64xf32>
    %38 = tpu.matmul %29, %37, %cst_17 {dimension_numbers = #tpu.dot_dimension_numbers<[1], [0], [0], [1], [0, 0, 1, 1], [], []>} : vector<128x64xf32>, vector<64x64xf32>, vector<128x64xf32> -> vector<128x64xf32>
    %c0_18 = arith.constant 0 : index
    %c0_19 = arith.constant 0 : index
    %39 = vector.load %arg8[%c0_18, %c0_19] : memref<64x64xf32, #tpu.memory_space<vmem>>, vector<64x64xf32>
    %cst_20 = arith.constant dense<0.000000e+00> : vector<128x64xf32>
    %40 = tpu.matmul %29, %39, %cst_20 {dimension_numbers = #tpu.dot_dimension_numbers<[1], [0], [0], [1], [0, 0, 1, 1], [], []>} : vector<128x64xf32>, vector<64x64xf32>, vector<128x64xf32> -> vector<128x64xf32>
    %c0_21 = arith.constant 0 : index
    %c0_22 = arith.constant 0 : index
    %41 = vector.load %arg9[%c0_21, %c0_22] : memref<1x64xf32, #tpu.memory_space<vmem>>, vector<1x64xf32>
    %42 = vector.shape_cast %41 : vector<1x64xf32> to vector<64xf32>
    %43 = vector.shape_cast %42 : vector<64xf32> to vector<1x64xf32>
    %44 = vector.broadcast %43 : vector<1x64xf32> to vector<128x64xf32>
    %45 = arith.addf %40, %44 : vector<128x64xf32>
    %c0_23 = arith.constant 0 : index
    %c0_24 = arith.constant 0 : index
    %c0_25 = arith.constant 0 : index
    %46 = vector.load %arg10[%c0_23, %c0_24, %c0_25] : memref<1x128x64xf32, #tpu.memory_space<vmem>>, vector<1x128x64xf32>
    %47 = vector.shape_cast %46 : vector<1x128x64xf32> to vector<128x64xf32>
    %48 = vector.shape_cast %36 : vector<128x64xf32> to vector<1x128x64xf32>
    tpu.vector_store %arg10[%c0_23, %c0_24, %c0_25], %48 {strides = array<i32>} : memref<1x128x64xf32, #tpu.memory_space<vmem>>, vector<1x128x64xf32>,
    %c0_26 = arith.constant 0 : index
    %c0_27 = arith.constant 0 : index
    %c0_28 = arith.constant 0 : index
    %49 = vector.load %arg11[%c0_26, %c0_27, %c0_28] : memref<1x128x64xf32, #tpu.memory_space<vmem>>, vector<1x128x64xf32>
    %50 = vector.shape_cast %49 : vector<1x128x64xf32> to vector<128x64xf32>
    %51 = vector.shape_cast %38 : vector<128x64xf32> to vector<1x128x64xf32>
    tpu.vector_store %arg11[%c0_26, %c0_27, %c0_28], %51 {strides = array<i32>} : memref<1x128x64xf32, #tpu.memory_space<vmem>>, vector<1x128x64xf32>,
    %c0_29 = arith.constant 0 : index
    %c0_30 = arith.constant 0 : index
    %c0_31 = arith.constant 0 : index
    %52 = vector.load %arg12[%c0_29, %c0_30, %c0_31] : memref<1x128x64xf32, #tpu.memory_space<vmem>>, vector<1x128x64xf32>
    %53 = vector.shape_cast %52 : vector<1x128x64xf32> to vector<128x64xf32>
    %54 = vector.shape_cast %45 : vector<128x64xf32> to vector<1x128x64xf32>
    tpu.vector_store %arg12[%c0_29, %c0_30, %c0_31], %54 {strides = array<i32>} : memref<1x128x64xf32, #tpu.memory_space<vmem>>, vector<1x128x64xf32>,
    return
  }
  func.func @transform_0(%arg0: i32, %arg1: i32) -> (i32, i32, i32) {
    %c0_i32 = arith.constant 0 : i32
    %c0_i32_0 = arith.constant 0 : i32
    return %arg0, %arg1, %c0_i32 : i32, i32, i32
  }
  func.func @transform_1(%arg0: i32, %arg1: i32) -> (i32, i32) {
    %c0_i32 = arith.constant 0 : i32
    %c0_i32_0 = arith.constant 0 : i32
    %c0_i32_1 = arith.constant 0 : i32
    return %c0_i32, %c0_i32_0 : i32, i32
  }
  func.func @transform_2(%arg0: i32, %arg1: i32) -> (i32, i32) {
    %c0_i32 = arith.constant 0 : i32
    %c0_i32_0 = arith.constant 0 : i32
    %c0_i32_1 = arith.constant 0 : i32
    return %c0_i32, %c0_i32_0 : i32, i32
  }
  func.func @transform_3(%arg0: i32, %arg1: i32) -> (i32, i32) {
    %c0_i32 = arith.constant 0 : i32
    %c0_i32_0 = arith.constant 0 : i32
    %c0_i32_1 = arith.constant 0 : i32
    return %c0_i32, %c0_i32_0 : i32, i32
  }
  func.func @transform_4(%arg0: i32, %arg1: i32) -> (i32, i32) {
    %c0_i32 = arith.constant 0 : i32
    %c0_i32_0 = arith.constant 0 : i32
    %c0_i32_1 = arith.constant 0 : i32
    return %c0_i32, %c0_i32_0 : i32, i32
  }
  func.func @transform_5(%arg0: i32, %arg1: i32) -> (i32, i32) {
    %c0_i32 = arith.constant 0 : i32
    %c0_i32_0 = arith.constant 0 : i32
    %c0_i32_1 = arith.constant 0 : i32
    return %c0_i32, %c0_i32_0 : i32, i32
  }
  func.func @transform_6(%arg0: i32, %arg1: i32) -> (i32, i32) {
    %c0_i32 = arith.constant 0 : i32
    %c0_i32_0 = arith.constant 0 : i32
    %c0_i32_1 = arith.constant 0 : i32
    return %c0_i32, %c0_i32_0 : i32, i32
  }
  func.func @transform_7(%arg0: i32, %arg1: i32) -> (i32, i32) {
    %c0_i32 = arith.constant 0 : i32
    %c0_i32_0 = arith.constant 0 : i32
    %c0_i32_1 = arith.constant 0 : i32
    return %c0_i32, %c0_i32_0 : i32, i32
  }
  func.func @transform_8(%arg0: i32, %arg1: i32) -> (i32, i32, i32) {
    %c0_i32 = arith.constant 0 : i32
    %c0_i32_0 = arith.constant 0 : i32
    return %arg0, %arg1, %c0_i32 : i32, i32, i32
  }
  func.func @transform_9(%arg0: i32, %arg1: i32) -> (i32, i32, i32) {
    %c0_i32 = arith.constant 0 : i32
    %c0_i32_0 = arith.constant 0 : i32
    return %arg0, %arg1, %c0_i32 : i32, i32, i32
  }
  func.func @transform_10(%arg0: i32, %arg1: i32) -> (i32, i32, i32) {
    %c0_i32 = arith.constant 0 : i32
    %c0_i32_0 = arith.constant 0 : i32
    return %arg0, %arg1, %c0_i32 : i32, i32, i32
  }
}

</mosaic_0001>

<bundles_post_ra>
// kernel: tpu_custom_call.1
= control target key start
LH: loop header
LB: loop body
LE: loop exit
PB: predicated region body
PF: predicated region fallthrough
CT: control target
= control target key end

     0   :  { %s1923_s13 = smov 0   ;;  %s1925_s14 = smov 0   ;;  %s2502_s0 = inlined_call_operand.vmem [shape: f32[2,256,64], index: 0, kind: input, shape index: {}]   ;;  %s2503_s1 = inlined_call_operand.vmem [shape: f32[1,64], index: 1, kind: input, shape index: {}]   ;;  %s2504_s2 = inlined_call_operand.vmem [shape: f32[1,64], index: 2, kind: input, shape index: {}]   ;;  %s2505_s3 = inlined_call_operand.vmem [shape: f32[64,64], index: 3, kind: input, shape index: {}]   ;;  %s2506_s4 = inlined_call_operand.vmem [shape: f32[1,64], index: 4, kind: input, shape index: {}]   ;;  %s2507_s5 = inlined_call_operand.vmem [shape: f32[64,64], index: 5, kind: input, shape index: {}]   ;;  %s2508_s6 = inlined_call_operand.vmem [shape: f32[64,64], index: 6, kind: input, shape index: {}]   ;;  %s2509_s7 = inlined_call_operand.vmem [shape: f32[1,64], index: 7, kind: input, shape index: {}]   ;;  %s2510_s8 = inlined_call_operand.vmem [shape: f32[2,256,64], index: 8, kind: output, shape index: {0}]   ;;  %s2511_s9 = inlined_call_operand.vmem [shape: f32[2,256,64], index: 9, kind: output, shape index: {1}]   ;;  %s2512_s10 = inlined_call_operand.vmem [shape: f32[2,256,64], index: 10, kind: output, shape index: {2}]  }
   0x1   :  { %s1927_s15 = smov 0   ;;  %s1929_s16 = smov 0  }
   0x2   :  { %s1931_s17 = smov 0  }
   0x3 LB: > { %s30_s18 = sadd.s32 1, %s1858_s15  ;;  %s33_s19 = sadd.s32 1, %s1862_s16  ;;  %s1866_s17 = sphi %s1931_s17, %s21_s17   ;;  %s1862_s16 = sphi %s1929_s16, %s2516_s16   ;;  %s1858_s15 = sphi %s1927_s15, %s2515_s15   ;;  %s1854_s14 = sphi %s1925_s14, %s2514_s14   ;;  %s1850_s13 = sphi %s1923_s13, %s2513_s13  }
   0x4   : > { %p31_p0 = scmp.ge.s32.totalorder %s30_s18, 2  ;;  %p1481_p1 = scmp.ge.s32.totalorder %s1866_s17, 1 }
   0x5   : > { %p342_p2 = scmp.lt.s32.totalorder %s1866_s17, 5 }
   0x6   : > { %s2518_s18 = smov (%p31_p0, %s30_s18), 0  ;;  %s2520_s19 = smov (!%p31_p0, %s33_s19), %s1862_s16 }
   0x7   : > { %p343_p3 = pnand %p1481_p1, %p342_p2  ;;  %p35_p4 = scmp.ge.s32.totalorder %s2520_s19, 2 }
   0x8   : > { %s1482_s20 = sshll.u32 (!%p343_p3), %s1850_s13, 4  ;;  %p407_p5 = scmp.lt.s32.totalorder (!%p343_p3), %s1854_s14, 1 }
   0x9   : > { %s2522_s19 = smov (%p35_p4, %s2520_s19), 0  ;;  %346 = sbr.rel (%p343_p3) target bundleno = 588 (0x24c), region = 52 }
   0xa   : > { %p409_p6 = scmp.lt.s32.totalorder (!%p343_p3), %s1482_s20, 31 }
   0xe   : > { %s2524_s14 = smov (!%p407_p5, %s1854_s14), 1  ;;  %s2526_s20 = smov (!%p409_p6, %s1482_s20), 31  ;;  %vm464_vm0 = vcmask 523264  }
   0xf   : > { %s1483_s21 = sshll.u32 %s2524_s14, 5 }
  0x10   : > { %s412_s22 = sadd.s32 %s1483_s21, %s2526_s20 }
  0x11   : > { %s1953_s23 = sshll.u32 %s412_s22, 3 }
  0x12   : > { %s1959_s26 = scalar_lea.vmem %s2502_s0, %s1953_s23  ;;  %s2356_s27 = scalar_lea.vmem %s2510_s8, %s1953_s23 }
  0x13   : > { %v446_v0 = vld [vmem:[%s1959_s26] sm:$0xff]  ;;  %v447_v2 = vld [vmem:[%s1959_s26 + $0x8] sm:$0xff]  ;;  %v448_v8 = vld [vmem:[%s1959_s26 + $0x10] sm:$0xff]  ;;  %s2393_s12 = scalar_lea.vmem %s2512_s10, %s1953_s23  ;;  %s2402_s20 = scalar_lea.vmem %s2511_s9, %s1953_s23 }
  0x14   : > { %v454_v1 = vld [vmem:[%s1959_s26 + $0x40] sm:$0xff]  ;;  %v465_v3 = vsel %vm464_vm0, %v446_v0, 0.0  ;;  %v455_v5 = vld [vmem:[%s1959_s26 + $0x48] sm:$0xff]  ;;  %v468_v6 = vsel %vm464_vm0, %v447_v2, 0.0  ;;  %v449_v9 = vld [vmem:[%s1959_s26 + $0x18] sm:$0xff]  ;;  %v471_v10 = vsel %vm464_vm0, %v448_v8, 0.0 }
  0x15   : > { %v489_v4 = vsel %vm464_vm0, %v454_v1, 0.0  ;;  %466 = vadd.xlane.f32.xlu0 %v465_v3  ;;  %v492_v7 = vsel %vm464_vm0, %v455_v5, 0.0  ;;  %v474_v11 = vsel %vm464_vm0, %v449_v9, 0.0  ;;  %v1974_v12 = vld [vmem:[%s1959_s26 + $0x50] sm:$0xff]  ;;  %v1977_v13 = vld [vmem:[%s1959_s26 + $0x58] sm:$0xff]  ;;  %v1984_v16 = vld [vmem:[%s1959_s26 + $0x20] sm:$0xff] }
  0x16   : > { %490 = vadd.xlane.f32.xlu1 %v489_v4  ;;  %v495_v14 = vsel %vm464_vm0, %v1974_v12, 0.0  ;;  %v498_v15 = vsel %vm464_vm0, %v1977_v13, 0.0  ;;  %v1987_v17 = vld [vmem:[%s1959_s26 + $0x28] sm:$0xff]  ;;  %v477_v18 = vsel %vm464_vm0, %v1984_v16, 0.0  ;;  %v1994_v20 = vld [vmem:[%s1959_s26 + $0x60] sm:$0xff]  ;;  %v2004_v24 = vld [vmem:[%s1959_s26 + $0x30] sm:$0xff] }
  0x17   : > { %v480_v19 = vsel %vm464_vm0, %v1987_v17, 0.0  ;;  %v1997_v21 = vld [vmem:[%s1959_s26 + $0x68] sm:$0xff]  ;;  %v501_v22 = vsel %vm464_vm0, %v1994_v20, 0.0  ;;  %v2007_v25 = vld [vmem:[%s1959_s26 + $0x38] sm:$0xff]  ;;  %v483_v26 = vsel %vm464_vm0, %v2004_v24, 0.0  ;;  %v2014_v28 = vld [vmem:[%s1959_s26 + $0x70] sm:$0xff] }
  0x18   : > { %v504_v23 = vsel %vm464_vm0, %v1997_v21, 0.0  ;;  %v486_v27 = vsel %vm464_vm0, %v2007_v25, 0.0  ;;  %v2017_v29 = vld [vmem:[%s1959_s26 + $0x78] sm:$0xff]  ;;  %v507_v30 = vsel %vm464_vm0, %v2014_v28, 0.0 }
  0x19   : > { %469 = vadd.xlane.f32.xlu0 %v468_v6  ;;  %v510_v31 = vsel %vm464_vm0, %v2017_v29, 0.0 }
  0x1a   : > { %493 = vadd.xlane.f32.xlu1 %v492_v7 }
  0x1d   : > { %472 = vadd.xlane.f32.xlu0 %v471_v10 }
  0x1e   : > { %475 = vadd.xlane.f32.xlu1 %v474_v11 }
  0x21   : > { %496 = vadd.xlane.f32.xlu0 %v495_v14 }
  0x22   : > { %499 = vadd.xlane.f32.xlu1 %v498_v15 }
  0x25   : > { %478 = vadd.xlane.f32.xlu0 %v477_v18 }
  0x26   : > { %481 = vadd.xlane.f32.xlu1 %v480_v19 }
  0x29   : > { %502 = vadd.xlane.f32.xlu0 %v501_v22 }
  0x2a   : > { %505 = vadd.xlane.f32.xlu1 %v504_v23 }
  0x2d   : > { %484 = vadd.xlane.f32.xlu0 %v483_v26 }
  0x2e   : > { %487 = vadd.xlane.f32.xlu1 %v486_v27 }
  0x31   : > { %508 = vadd.xlane.f32.xlu0 %v507_v30 }
  0x32   : > { %511 = vadd.xlane.f32.xlu1 %v510_v31 }
  0x9e   : > { %v467_v32 = vpop.xlane.xlu0 %466 }
  0x9f   : > { %v491_v33 = vpop.xlane.xlu1 %490  ;;  %v514_v34 = vmul.f32 0.015625, %v467_v32 }
  0xa0   : > { %v522_v35 = vmul.f32 0.015625, %v491_v33 }
  0xa1   : > { %v2023_v36 = vsub.f32 %v446_v0, %v514_v34 }
  0xa2   : > { %v2025_v37 = vsub.f32 %v454_v1, %v522_v35  ;;  %v470_v38 = vpop.xlane.xlu0 %469 }
  0xa3   : > { %v494_v39 = vpop.xlane.xlu1 %493  ;;  %v515_v40 = vmul.f32 0.015625, %v470_v38  ;;  %v546_v42 = vmul.f32 %v2023_v36, %v2023_v36 }
  0xa4   : > { %v523_v41 = vmul.f32 0.015625, %v494_v39  ;;  %v554_v43 = vmul.f32 %v2025_v37, %v2025_v37 }
  0xa5   : > { %v2031_v44 = vsub.f32 %v447_v2, %v515_v40  ;;  %v562_v46 = vsel %vm464_vm0, %v546_v42, 0.0 }
  0xa6   : > { %v2033_v45 = vsub.f32 %v455_v5, %v523_v41  ;;  %563 = vadd.xlane.f32.xlu0 %v562_v46  ;;  %v473_v47 = vpop.xlane.xlu0 %472  ;;  %v586_v49 = vsel %vm464_vm0, %v554_v43, 0.0 }
  0xa7   : > { %v476_v48 = vpop.xlane.xlu1 %475  ;;  %v516_v50 = vmul.f32 0.015625, %v473_v47  ;;  %v547_v52 = vmul.f32 %v2031_v44, %v2031_v44 }
  0xa8   : > { %v517_v51 = vmul.f32 0.015625, %v476_v48  ;;  %v555_v53 = vmul.f32 %v2033_v45, %v2033_v45 }
  0xa9   : > { %v2041_v54 = vsub.f32 %v448_v8, %v516_v50  ;;  %v565_v56 = vsel %vm464_vm0, %v547_v52, 0.0  ;;  %v724_v50 = vld [vmem:[%s2505_s3 + $0x30] sm:$0xff] }
  0xaa   : > { %v2043_v55 = vsub.f32 %v449_v9, %v517_v51  ;;  %587 = vadd.xlane.f32.xlu0 %v586_v49  ;;  %566 = vadd.xlane.f32.xlu1 %v565_v56  ;;  %v497_v57 = vpop.xlane.xlu0 %496  ;;  %v589_v59 = vsel %vm464_vm0, %v555_v53, 0.0  ;;  %v722_v56 = vld [vmem:[%s2505_s3 + $0x20] sm:$0xff] }
  0xab   : > { %v500_v58 = vpop.xlane.xlu1 %499  ;;  %v524_v60 = vmul.f32 0.015625, %v497_v57  ;;  %v548_v62 = vmul.f32 %v2041_v54, %v2041_v54 }
  0xac   : > { %v525_v61 = vmul.f32 0.015625, %v500_v58  ;;  %v549_v63 = vmul.f32 %v2043_v55, %v2043_v55  ;;  %v721_v58 = vld [vmem:[%s2505_s3 + $0x18] sm:$0xff] }
  0xad   : > { %v2052_v0 = vsub.f32 %v1974_v12, %v524_v60  ;;  %v568_v2 = vsel %vm464_vm0, %v548_v62, 0.0  ;;  %v719_v60 = vld [vmem:[%s2505_s3 + $0x8] sm:$0xff]  ;;  %v2140_v62 = vld [vmem:[%s2508_s6 + $0x38] sm:$0xff] }
  0xae   : > { %v2055_v1 = vsub.f32 %v1977_v13, %v525_v61  ;;  %590 = vadd.xlane.f32.xlu1 %v589_v59  ;;  %569 = vadd.xlane.f32.xlu0 %v568_v2  ;;  %v479_v3 = vpop.xlane.xlu0 %478  ;;  %v571_v5 = vsel %vm464_vm0, %v549_v63, 0.0  ;;  %v720_v59 = vld [vmem:[%s2505_s3 + $0x10] sm:$0xff]  ;;  %v718_v61 = vld [vmem:[%s2505_s3] sm:$0xff]  ;;  %v2146_v63 = vld [vmem:[%s2507_s5 + $0x38] sm:$0xff] }
  0xaf   : > { %v482_v4 = vpop.xlane.xlu1 %481  ;;  %v518_v6 = vmul.f32 0.015625, %v479_v3  ;;  %v556_v8 = vmul.f32 %v2052_v0, %v2052_v0 }
  0xb0   : > { %v519_v7 = vmul.f32 0.015625, %v482_v4  ;;  %v557_v9 = vmul.f32 %v2055_v1, %v2055_v1 }
  0xb1   : > { %v2064_v10 = vsub.f32 %v1984_v16, %v518_v6  ;;  %v592_v12 = vsel %vm464_vm0, %v556_v8, 0.0 }
  0xb2   : > { %v2067_v11 = vsub.f32 %v1987_v17, %v519_v7  ;;  %572 = vadd.xlane.f32.xlu1 %v571_v5  ;;  %593 = vadd.xlane.f32.xlu0 %v592_v12  ;;  %v503_v13 = vpop.xlane.xlu0 %502  ;;  %v595_v15 = vsel %vm464_vm0, %v557_v9, 0.0 }
  0xb3   : > { %v506_v14 = vpop.xlane.xlu1 %505  ;;  %v526_v18 = vmul.f32 0.015625, %v503_v13  ;;  %v550_v22 = vmul.f32 %v2064_v10, %v2064_v10 }
  0xb4   : > { %v527_v19 = vmul.f32 0.015625, %v506_v14  ;;  %v551_v16 = vmul.f32 %v2067_v11, %v2067_v11 }
  0xb5   : > { %v2076_v23 = vsub.f32 %v1994_v20, %v526_v18  ;;  %v574_v26 = vsel %vm464_vm0, %v550_v22, 0.0 }
  0xb6   : > { %v2079_v17 = vsub.f32 %v1997_v21, %v527_v19  ;;  %596 = vadd.xlane.f32.xlu1 %v595_v15  ;;  %575 = vadd.xlane.f32.xlu0 %v574_v26  ;;  %v485_v27 = vpop.xlane.xlu0 %484  ;;  %v577_v31 = vsel %vm464_vm0, %v551_v16, 0.0 }
  0xb7   : > { %v488_v30 = vpop.xlane.xlu1 %487  ;;  %v520_v32 = vmul.f32 0.015625, %v485_v27  ;;  %v558_v34 = vmul.f32 %v2076_v23, %v2076_v23 }
  0xb8   : > { %v521_v33 = vmul.f32 0.015625, %v488_v30  ;;  %v559_v20 = vmul.f32 %v2079_v17, %v2079_v17 }
  0xb9   : > { %v2088_v35 = vsub.f32 %v2004_v24, %v520_v32  ;;  %v598_v38 = vsel %vm464_vm0, %v558_v34, 0.0 }
  0xba   : > { %v2091_v21 = vsub.f32 %v2007_v25, %v521_v33  ;;  %578 = vadd.xlane.f32.xlu1 %v577_v31  ;;  %599 = vadd.xlane.f32.xlu0 %v598_v38  ;;  %v509_v39 = vpop.xlane.xlu0 %508  ;;  %v601_v41 = vsel %vm464_vm0, %v559_v20, 0.0  ;;  %v725_v25 = vld [vmem:[%s2505_s3 + $0x38] sm:$0xff] }
  0xbb   : > { %v512_v40 = vpop.xlane.xlu1 %511  ;;  %v528_v42 = vmul.f32 0.015625, %v509_v39  ;;  %v552_v46 = vmul.f32 %v2088_v35, %v2088_v35  ;;  %1620 = vmatprep.subr.mxu0 %v725_v25  ;;  %1740 = vmatprep.subr.mxu1 %v725_v25 }
  0xbc   : > { %v529_v43 = vmul.f32 0.015625, %v512_v40  ;;  %v553_v24 = vmul.f32 %v2091_v21, %v2091_v21  ;;  %1621 = vmatpush3.msra.mxu0 %v725_v25  ;;  %1748 = vmatpush3.msra.mxu1 %v725_v25  ;;  %v2152_v40 = vld [vmem:[%s2503_s1] ss:$0 sm:$0xff] }
  0xbd   : > { %v2103_v47 = vsub.f32 %v2014_v28, %v528_v42  ;;  %v580_v49 = vsel %vm464_vm0, %v552_v46, 0.0  ;;  %1622 = vmatprep.subr.mxu0 %v724_v50  ;;  %1741 = vmatprep.subr.mxu1 %v724_v50  ;;  %v2158_v25 = vld [vmem:[%s2504_s2] ss:$0 sm:$0xff] }
  0xbe   : > { %v2106_v48 = vsub.f32 %v2017_v29, %v529_v43  ;;  %602 = vadd.xlane.f32.xlu1 %v601_v41  ;;  %581 = vadd.xlane.f32.xlu0 %v580_v49  ;;  %v583_v51 = vsel %vm464_vm0, %v553_v24, 0.0  ;;  %v723_v29 = vld [vmem:[%s2505_s3 + $0x28] sm:$0xff] }
  0xbf   : > { %v560_v52 = vmul.f32 %v2103_v47, %v2103_v47  ;;  %1623 = vmatpush3.msra.mxu0 %v724_v50  ;;  %1749 = vmatpush3.msra.mxu1 %v724_v50 }
  0xc0   : > { %v561_v28 = vmul.f32 %v2106_v48, %v2106_v48  ;;  %1624 = vmatprep.subr.mxu0 %v723_v29  ;;  %1742 = vmatprep.subr.mxu1 %v723_v29 }
  0xc1   : > { %v604_v53 = vsel %vm464_vm0, %v560_v52, 0.0  ;;  %1625 = vmatpush3.msra.mxu0 %v723_v29  ;;  %1750 = vmatpush3.msra.mxu1 %v723_v29 }
  0xc2   : > { %584 = vadd.xlane.f32.xlu1 %v583_v51  ;;  %605 = vadd.xlane.f32.xlu0 %v604_v53  ;;  %v607_v57 = vsel %vm464_vm0, %v561_v28, 0.0 }
  0xc3   : > { %1626 = vmatprep.subr.mxu0 %v722_v56  ;;  %1743 = vmatprep.subr.mxu1 %v722_v56 }
  0xc4   : > { %1627 = vmatpush3.msra.mxu0 %v722_v56  ;;  %1751 = vmatpush3.msra.mxu1 %v722_v56 }
  0xc5   : > { %1628 = vmatprep.subr.mxu0 %v721_v58  ;;  %1744 = vmatprep.subr.mxu1 %v721_v58 }
  0xc6   : > { %608 = vadd.xlane.f32.xlu1 %v607_v57  ;;  %1629 = vmatpush3.msra.mxu0 %v721_v58 }
  0xc7   : > { %1630 = vmatprep.subr.mxu0 %v720_v59  ;;  %1752 = vmatpush3.msra.mxu1 %v721_v58 }
  0xc8   : > { %1631 = vmatpush3.msra.mxu0 %v720_v59  ;;  %1745 = vmatprep.subr.mxu1 %v720_v59 }
  0xc9   : > { %1632 = vmatprep.subr.mxu0 %v719_v60  ;;  %1753 = vmatpush3.msra.mxu1 %v720_v59 }
  0xca   : > { %1633 = vmatpush3.msra.mxu0 %v719_v60  ;;  %1746 = vmatprep.subr.mxu1 %v719_v60 }
  0xcb   : > { %1634 = vmatprep.subr.mxu0 %v718_v61  ;;  %1754 = vmatpush3.msra.mxu1 %v719_v60 }
  0xcc   : > { %1635 = vmatpush3.msra.mxu0 %v718_v61  ;;  %1747 = vmatprep.subr.mxu1 %v718_v61 }
  0xcd   : > { %1755 = vmatpush3.msra.mxu1 %v718_v61  ;;  %1700 = vmatprep.subr.mxu0 %v2140_v62 }
  0xce   : > { %1660 = vmatprep.subr.mxu1 %v2146_v63 }
 0x12f   : > { %v564_v2 = vpop.xlane.xlu0 %563 }
 0x130   : > { %v610_v3 = vmul.f32 0.015625, %v564_v2 }
 0x132   : > { %v626_v4 = vadd.f32 1e-05, %v610_v3 }
 0x133   : > { %v567_v5 = vpop.xlane.xlu1 %566  ;;  %v588_v6 = vpop.xlane.xlu0 %587 }
 0x134   : > { %1796 = vrsqrt.f32 %v626_v4  ;;  %v611_v7 = vmul.f32 0.015625, %v567_v5  ;;  %v618_v8 = vmul.f32 0.015625, %v588_v6 }
 0x136   : > { %v627_v9 = vadd.f32 1e-05, %v611_v7  ;;  %v634_v12 = vadd.f32 1e-05, %v618_v8 }
 0x137   : > { %v591_v13 = vpop.xlane.xlu1 %590  ;;  %v570_v14 = vpop.xlane.xlu0 %569 }
 0x138   : > { %1798 = vrsqrt.f32 %v627_v9  ;;  %v619_v15 = vmul.f32 0.015625, %v591_v13  ;;  %v612_v18 = vmul.f32 0.015625, %v570_v14  ;;  %v1085_v14 = vld [vmem:[%s2508_s6 + $0x30] sm:$0xff] }
 0x139   : > { %1800 = vrsqrt.f32 %v634_v12 }
 0x13a   : > { %v635_v19 = vadd.f32 1e-05, %v619_v15  ;;  %v628_v22 = vadd.f32 1e-05, %v612_v18 }
 0x13b   : > { %v573_v16 = vpop.xlane.xlu1 %572  ;;  %v594_v26 = vpop.xlane.xlu0 %593 }
 0x13c   : > { %1802 = vrsqrt.f32 %v635_v19  ;;  %v613_v27 = vmul.f32 0.015625, %v573_v16  ;;  %v620_v30 = vmul.f32 0.015625, %v594_v26 }
 0x13d   : > { %1804 = vrsqrt.f32 %v628_v22 }
 0x13e   : > { %v629_v31 = vadd.f32 1e-05, %v613_v27  ;;  %v636_v32 = vadd.f32 1e-05, %v620_v30 }
 0x13f   : > { %v597_v33 = vpop.xlane.xlu1 %596  ;;  %v576_v34 = vpop.xlane.xlu0 %575 }
 0x140   : > { %1806 = vrsqrt.f32 %v629_v31  ;;  %v621_v20 = vmul.f32 0.015625, %v597_v33  ;;  %v614_v38 = vmul.f32 0.015625, %v576_v34 }
 0x141   : > { %v1797_v39 = vpop.eup %1796  ;;  %1808 = vrsqrt.f32 %v636_v32 }
 0x142   : > { %v637_v41 = vadd.f32 1e-05, %v621_v20  ;;  %v630_v42 = vadd.f32 1e-05, %v614_v38  ;;  %v658_v43 = vmul.f32 %v1797_v39, %v2023_v36 }
 0x143   : > { %v579_v46 = vpop.xlane.xlu1 %578  ;;  %v600_v24 = vpop.xlane.xlu0 %599 }
 0x144   : > { %1810 = vrsqrt.f32 %v637_v41  ;;  %v615_v49 = vmul.f32 0.015625, %v579_v46  ;;  %v622_v50 = vmul.f32 0.015625, %v600_v24  ;;  %v680_v51 = vmul.f32 %v2152_v40, %v658_v43  ;;  %v931_v41 = vld [vmem:[%s2507_s5 + $0x28] sm:$0xff] }
 0x145   : > { %v1799_v52 = vpop.eup %1798  ;;  %1812 = vrsqrt.f32 %v630_v42 }
 0x146   : > { %v1801_v28 = vpop.eup %1800  ;;  %v631_v29 = vadd.f32 1e-05, %v615_v49  ;;  %v638_v53 = vadd.f32 1e-05, %v622_v50  ;;  %v2162_v56 = vadd.f32 %v2158_v25, %v680_v51  ;;  %v659_v36 = vmul.f32 %v1799_v52, %v2031_v44 }
 0x147   : > { %v603_v57 = vpop.xlane.xlu1 %602  ;;  %v582_v58 = vpop.xlane.xlu0 %581  ;;  %v666_v59 = vmul.f32 %v1801_v28, %v2025_v37  ;;  %v1081_v28 = vld [vmem:[%s2508_s6 + $0x10] sm:$0xff] }
 0x148   : > { %1814 = vrsqrt.f32 %v631_v29  ;;  %v623_v60 = vmul.f32 0.015625, %v603_v57  ;;  %v616_v61 = vmul.f32 0.015625, %v582_v58  ;;  %1636 = vmatprep.mubr.msk.f32.mxu0 %vm464_vm0, %v2162_v56  ;;  %v681_v2 = vmul.f32 %v2152_v40, %v659_v36 }
 0x149   : > { %v1803_v3 = vpop.eup %1802  ;;  %1816 = vrsqrt.f32 %v638_v53  ;;  %v688_v4 = vmul.f32 %v2152_v40, %v666_v59  ;;  %v929_v59 = vld [vmem:[%s2507_s5 + $0x18] sm:$0xff] }
 0x14a   : > { %v1805_v5 = vpop.eup %1804  ;;  %v639_v6 = vadd.f32 1e-05, %v623_v60  ;;  %v632_v7 = vadd.f32 1e-05, %v616_v61  ;;  %v2171_v44 = vadd.f32 %v2158_v25, %v681_v2  ;;  %v667_v37 = vmul.f32 %v1803_v3, %v2033_v45  ;;  %v928_v2 = vld [vmem:[%s2507_s5 + $0x10] sm:$0xff] }
 0x14b   : > { %v585_v8 = vpop.xlane.xlu1 %584  ;;  %v606_v9 = vpop.xlane.xlu0 %605  ;;  %v2175_v12 = vadd.f32 %v2158_v25, %v688_v4  ;;  %v660_v13 = vmul.f32 %v1805_v5, %v2041_v54  ;;  %v1084_v54 = vld [vmem:[%s2508_s6 + $0x28] sm:$0xff] }
 0x14c   : > { %1818 = vrsqrt.f32 %v639_v6  ;;  %v617_v15 = vmul.f32 0.015625, %v585_v8  ;;  %v624_v18 = vmul.f32 0.015625, %v606_v9  ;;  %1637 = vmatmul.mubr.msk.f32.vlgmr.msra.gmra.mxu0 %vm464_vm0, %v2171_v44  ;;  %v689_v19 = vmul.f32 %v2152_v40, %v667_v37  ;;  %v1079_v37 = vld [vmem:[%s2508_s6] sm:$0xff] }
 0x14d   : > { %v1807_v45 = vpop.eup %1806  ;;  %1820 = vrsqrt.f32 %v632_v7  ;;  %1648 = vmatprep.mubr.msk.f32.mxu1 %vm464_vm0, %v2175_v12  ;;  %v682_v22 = vmul.f32 %v2152_v40, %v660_v13  ;;  %1701 = vmatpush3.msra.mxu0 %v2140_v62  ;;  %v932_v62 = vld [vmem:[%s2507_s5 + $0x30] sm:$0xff] }
 0x14e   : > { %v1809_v16 = vpop.eup %1808  ;;  %v633_v26 = vadd.f32 1e-05, %v617_v15  ;;  %v640_v27 = vadd.f32 1e-05, %v624_v18  ;;  %v2192_v30 = vadd.f32 %v2158_v25, %v689_v19  ;;  %v661_v31 = vmul.f32 %v1807_v45, %v2043_v55  ;;  %1702 = vmatprep.subr.mxu0 %v1085_v14  ;;  %v1083_v55 = vld [vmem:[%s2508_s6 + $0x20] sm:$0xff] }
 0x14f   : > { %v609_v32 = vpop.xlane.xlu1 %608  ;;  %v2196_v33 = vadd.f32 %v2158_v25, %v682_v22  ;;  %v668_v34 = vmul.f32 %v1809_v16, %v2052_v0  ;;  %1703 = vmatpush3.msra.mxu0 %v1085_v14  ;;  %v926_v45 = vld [vmem:[%s2507_s5] sm:$0xff] }
 0x150   : > { %1822 = vrsqrt.f32 %v633_v26  ;;  %v625_v20 = vmul.f32 0.015625, %v609_v32  ;;  %1649 = vmatmul.mubr.msk.f32.vlgmr.msra.gmra.mxu1 %vm464_vm0, %v2192_v30  ;;  %v683_v38 = vmul.f32 %v2152_v40, %v661_v31  ;;  %1704 = vmatprep.subr.mxu0 %v1084_v54 }
 0x151   : > { %v1811_v39 = vpop.eup %1810  ;;  %1824 = vrsqrt.f32 %v640_v27  ;;  %1639 = vmatprep.mubr.msk.f32.mxu0 %vm464_vm0, %v2196_v33  ;;  %v690_v0 = vmul.f32 %v2152_v40, %v668_v34  ;;  %1661 = vmatpush3.msra.mxu1 %v2146_v63  ;;  %v1082_v63 = vld [vmem:[%s2508_s6 + $0x18] sm:$0xff] }
 0x152   : > { %v1813_v42 = vpop.eup %1812  ;;  %v641_v43 = vadd.f32 1e-05, %v625_v20  ;;  %v2216_v46 = vadd.f32 %v2158_v25, %v683_v38  ;;  %v669_v24 = vmul.f32 %v1811_v39, %v2055_v1  ;;  %1662 = vmatprep.subr.mxu1 %v932_v62  ;;  %1705 = vmatpush3.msra.mxu0 %v1084_v54  ;;  %v930_v1 = vld [vmem:[%s2507_s5 + $0x20] sm:$0xff] }
 0x153   : > { %v2220_v49 = vadd.f32 %v2158_v25, %v690_v0  ;;  %v662_v50 = vmul.f32 %v1813_v42, %v2064_v10  ;;  %1663 = vmatpush3.msra.mxu1 %v932_v62  ;;  %1706 = vmatprep.subr.mxu0 %v1083_v55 }
 0x154   : > { %1826 = vrsqrt.f32 %v641_v43  ;;  %1640 = vmatmul.mubr.msk.f32.gmra.mxu0 %vm464_vm0, %v2216_v46  ;;  %v691_v51 = vmul.f32 %v2152_v40, %v669_v24  ;;  %1664 = vmatprep.subr.mxu1 %v931_v41 }
 0x155   : > { %v1815_v52 = vpop.eup %1814  ;;  %1651 = vmatprep.mubr.msk.f32.mxu1 %vm464_vm0, %v2220_v49  ;;  %v684_v10 = vmul.f32 %v2152_v40, %v662_v50  ;;  %1707 = vmatpush3.msra.mxu0 %v1083_v55 }
 0x156   : > { %v1817_v29 = vpop.eup %1816  ;;  %v2239_v53 = vadd.f32 %v2158_v25, %v691_v51  ;;  %v663_v36 = vmul.f32 %v1815_v52, %v2067_v11  ;;  %1665 = vmatpush3.msra.mxu1 %v931_v41  ;;  %1708 = vmatprep.subr.mxu0 %v1082_v63  ;;  %v1080_v11 = vld [vmem:[%s2508_s6 + $0x8] sm:$0xff] }
 0x157   : > { %v2243_v57 = vadd.f32 %v2158_v25, %v684_v10  ;;  %v670_v58 = vmul.f32 %v1817_v29, %v2076_v23  ;;  %1666 = vmatprep.subr.mxu1 %v930_v1  ;;  %1709 = vmatpush3.msra.mxu0 %v1082_v63 }
 0x158   : > { %1652 = vmatmul.mubr.msk.f32.gmra.mxu1 %vm464_vm0, %v2239_v53  ;;  %v685_v60 = vmul.f32 %v2152_v40, %v663_v36  ;;  %1710 = vmatprep.subr.mxu0 %v1081_v28 }
 0x159   : > { %v1819_v61 = vpop.eup %1818  ;;  %1642 = vmatprep.mubr.msk.f32.mxu0 %vm464_vm0, %v2243_v57  ;;  %v692_v23 = vmul.f32 %v2152_v40, %v670_v58  ;;  %1667 = vmatpush3.msra.mxu1 %v930_v1 }
 0x15a   : > { %v1821_v3 = vpop.eup %1820  ;;  %v707_v4 = vadd.f32 %v2158_v25, %v685_v60  ;;  %v671_v5 = vmul.f32 %v1819_v61, %v2079_v17  ;;  %1668 = vmatprep.subr.mxu1 %v929_v59  ;;  %1711 = vmatpush3.msra.mxu0 %v1081_v28  ;;  %v927_v17 = vld [vmem:[%s2507_s5 + $0x8] sm:$0xff]  ;;  %v2385_v28 = vld [vmem:[%s2509_s7] ss:$0 sm:$0xff] }
 0x15b   : > { %v2264_v6 = vadd.f32 %v2158_v25, %v692_v23  ;;  %v664_v7 = vmul.f32 %v1821_v3, %v2088_v35  ;;  %1669 = vmatpush3.msra.mxu1 %v929_v59  ;;  %1712 = vmatprep.subr.mxu0 %v1080_v11 }
 0x15c   : > { %1643 = vmatmul.mubr.msk.f32.gmra.mxu0 %vm464_vm0, %v707_v4  ;;  %v693_v8 = vmul.f32 %v2152_v40, %v671_v5  ;;  %1670 = vmatprep.subr.mxu1 %v928_v2 }
 0x15d   : > { %v1823_v9 = vpop.eup %1822  ;;  %1654 = vmatprep.mubr.msk.f32.mxu1 %vm464_vm0, %v2264_v6  ;;  %v686_v35 = vmul.f32 %v2152_v40, %v664_v7  ;;  %1713 = vmatpush3.msra.mxu0 %v1080_v11 }
 0x15e   : > { %v1825_v13 = vpop.eup %1824  ;;  %v715_v14 = vadd.f32 %v2158_v25, %v693_v8  ;;  %v665_v15 = vmul.f32 %v1823_v9, %v2091_v21  ;;  %1671 = vmatpush3.msra.mxu1 %v928_v2  ;;  %1714 = vmatprep.subr.mxu0 %v1079_v37 }
 0x15f   : > { %v708_v18 = vadd.f32 %v2158_v25, %v686_v35  ;;  %v672_v19 = vmul.f32 %v1825_v13, %v2103_v47  ;;  %1672 = vmatprep.subr.mxu1 %v927_v17  ;;  %1715 = vmatpush3.msra.mxu0 %v1079_v37 }
 0x160   : > { %1655 = vmatmul.mubr.msk.f32.gmra.mxu1 %vm464_vm0, %v715_v14  ;;  %v687_v22 = vmul.f32 %v2152_v40, %v665_v15 }
 0x161   : > { %v1827_v54 = vpop.eup %1826  ;;  %1645 = vmatprep.mubr.msk.f32.mxu0 %vm464_vm0, %v708_v18  ;;  %v694_v21 = vmul.f32 %v2152_v40, %v672_v19  ;;  %1673 = vmatpush3.msra.mxu1 %v927_v17 }
 0x162   : > { %v709_v16 = vadd.f32 %v2158_v25, %v687_v22  ;;  %v673_v47 = vmul.f32 %v1827_v54, %v2106_v48  ;;  %1674 = vmatprep.subr.mxu1 %v926_v45  ;;  %v1496_v48 = vld [vmem:[%s2506_s4] ss:$0 sm:$0xff] }
 0x163   : > { %v716_v26 = vadd.f32 %v2158_v25, %v694_v21  ;;  %1675 = vmatpush3.msra.mxu1 %v926_v45 }
 0x164   : > { %1646 = vmatmul.mubr.msk.f32.gmra.mxu0 %vm464_vm0, %v709_v16  ;;  %v695_v27 = vmul.f32 %v2152_v40, %v673_v47 }
 0x165   : > { %1657 = vmatprep.mubr.msk.f32.mxu1 %vm464_vm0, %v716_v26  ;;  %1716 = vmatprep.mubr.msk.f32.mxu0 %vm464_vm0, %v2162_v56 }
 0x166   : > { %v717_v31 = vadd.f32 %v2158_v25, %v695_v27 }
 0x168   : > { %1658 = vmatmul.mubr.msk.f32.gmra.mxu1 %vm464_vm0, %v717_v31  ;;  %1717 = vmatmul.mubr.msk.f32.vlgmr.msra.gmra.mxu0 %vm464_vm0, %v2171_v44 }
 0x169   : > { %1676 = vmatprep.mubr.msk.f32.mxu1 %vm464_vm0, %v2162_v56  ;;  %1719 = vmatprep.mubr.msk.f32.mxu0 %vm464_vm0, %v2196_v33 }
 0x16c   : > { %1677 = vmatmul.mubr.msk.f32.vlgmr.msra.gmra.mxu1 %vm464_vm0, %v2171_v44  ;;  %1720 = vmatmul.mubr.msk.f32.gmra.mxu0 %vm464_vm0, %v2216_v46 }
 0x16d   : > { %1679 = vmatprep.mubr.msk.f32.mxu1 %vm464_vm0, %v2196_v33  ;;  %1722 = vmatprep.mubr.msk.f32.mxu0 %vm464_vm0, %v2243_v57 }
 0x170   : > { %1680 = vmatmul.mubr.msk.f32.gmra.mxu1 %vm464_vm0, %v2216_v46  ;;  %1723 = vmatmul.mubr.msk.f32.gmra.mxu0 %vm464_vm0, %v707_v4 }
 0x171   : > { %1682 = vmatprep.mubr.msk.f32.mxu1 %vm464_vm0, %v2243_v57  ;;  %1725 = vmatprep.mubr.msk.f32.mxu0 %vm464_vm0, %v708_v18 }
 0x174   : > { %1683 = vmatmul.mubr.msk.f32.gmra.mxu1 %vm464_vm0, %v707_v4  ;;  %1726 = vmatmul.mubr.msk.f32.gmra.mxu0 %vm464_vm0, %v709_v16 }
 0x175   : > { %1685 = vmatprep.mubr.msk.f32.mxu1 %vm464_vm0, %v708_v18  ;;  %1728 = vmatprep.mubr.msk.f32.mxu0 %vm464_vm0, %v2175_v12 }
 0x178   : > { %1686 = vmatmul.mubr.msk.f32.gmra.mxu1 %vm464_vm0, %v709_v16  ;;  %1729 = vmatmul.mubr.msk.f32.gmra.mxu0 %vm464_vm0, %v2192_v30 }
 0x179   : > { %1688 = vmatprep.mubr.msk.f32.mxu1 %vm464_vm0, %v2175_v12  ;;  %1731 = vmatprep.mubr.msk.f32.mxu0 %vm464_vm0, %v2220_v49 }
 0x17c   : > { %1689 = vmatmul.mubr.msk.f32.gmra.mxu1 %vm464_vm0, %v2192_v30  ;;  %1732 = vmatmul.mubr.msk.f32.gmra.mxu0 %vm464_vm0, %v2239_v53 }
 0x17d   : > { %1691 = vmatprep.mubr.msk.f32.mxu1 %vm464_vm0, %v2220_v49  ;;  %1734 = vmatprep.mubr.msk.f32.mxu0 %vm464_vm0, %v2264_v6 }
 0x180   : > { %1692 = vmatmul.mubr.msk.f32.gmra.mxu1 %vm464_vm0, %v2239_v53  ;;  %1735 = vmatmul.mubr.msk.f32.gmra.mxu0 %vm464_vm0, %v715_v14 }
 0x181   : > { %1694 = vmatprep.mubr.msk.f32.mxu1 %vm464_vm0, %v2264_v6  ;;  %1737 = vmatprep.mubr.msk.f32.mxu0 %vm464_vm0, %v716_v26 }
 0x184   : > { %1695 = vmatmul.mubr.msk.f32.gmra.mxu1 %vm464_vm0, %v715_v14  ;;  %1738 = vmatmul.mubr.msk.f32.gmra.mxu0 %vm464_vm0, %v717_v31 }
 0x185   : > { %1697 = vmatprep.mubr.msk.f32.mxu1 %vm464_vm0, %v716_v26 }
 0x188   : > { %1698 = vmatmul.mubr.msk.f32.gmra.mxu1 %vm464_vm0, %v717_v31 }
 0x20c   : > { %v1638_v40 = vpop.f32.mrf.mxu0 }
 0x20d   : > { %v853_v25 = vadd.f32 %v1638_v40, %v1496_v48 }
 0x20e   : > { %v847_v56 = vpop.f32.mrf.mxu0 }
 0x20f   : > { %1240 = vst.msk [vmem:[%s2356_s27 + $0x8] sm:$0xff] %vm464_vm0, %v853_v25  ;;  %v848_v44 = vadd.f32 %v1496_v48, %v847_v56 }
 0x210   : > { %v1650_v12 = vpop.f32.mrf.mxu1 }
 0x211   : > { %1239 = vst.msk [vmem:[%s2356_s27] sm:$0xff] %vm464_vm0, %v848_v44  ;;  %v893_v30 = vadd.f32 %v1650_v12, %v1496_v48 }
 0x212   : > { %v887_v32 = vpop.f32.mrf.mxu1 }
 0x213   : > { %1248 = vst.msk [vmem:[%s2356_s27 + $0x48] sm:$0xff] %vm464_vm0, %v893_v30  ;;  %v888_v33 = vadd.f32 %v1496_v48, %v887_v32 }
 0x214   : > { %v1641_v34 = vpop.f32.mrf.mxu0 }
 0x215   : > { %1247 = vst.msk [vmem:[%s2356_s27 + $0x40] sm:$0xff] %vm464_vm0, %v888_v33  ;;  %v863_v62 = vadd.f32 %v1641_v34, %v1496_v48 }
 0x216   : > { %v857_v20 = vpop.f32.mrf.mxu0 }
 0x217   : > { %1242 = vst.msk [vmem:[%s2356_s27 + $0x18] sm:$0xff] %vm464_vm0, %v863_v62  ;;  %v858_v38 = vadd.f32 %v1496_v48, %v857_v20 }
 0x218   : > { %v1653_v55 = vpop.f32.mrf.mxu1 }
 0x219   : > { %1241 = vst.msk [vmem:[%s2356_s27 + $0x10] sm:$0xff] %vm464_vm0, %v858_v38  ;;  %v903_v39 = vadd.f32 %v1653_v55, %v1496_v48 }
 0x21a   : > { %v897_v0 = vpop.f32.mrf.mxu1 }
 0x21b   : > { %1250 = vst.msk [vmem:[%s2356_s27 + $0x58] sm:$0xff] %vm464_vm0, %v903_v39  ;;  %v898_v41 = vadd.f32 %v1496_v48, %v897_v0 }
 0x21c   : > { %v1644_v42 = vpop.f32.mrf.mxu0 }
 0x21d   : > { %1249 = vst.msk [vmem:[%s2356_s27 + $0x50] sm:$0xff] %vm464_vm0, %v898_v41  ;;  %v873_v43 = vadd.f32 %v1644_v42, %v1496_v48 }
 0x21e   : > { %v867_v46 = vpop.f32.mrf.mxu0 }
 0x21f   : > { %1244 = vst.msk [vmem:[%s2356_s27 + $0x28] sm:$0xff] %vm464_vm0, %v873_v43  ;;  %v868_v24 = vadd.f32 %v1496_v48, %v867_v46 }
 0x220   : > { %v1656_v49 = vpop.f32.mrf.mxu1 }
 0x221   : > { %1243 = vst.msk [vmem:[%s2356_s27 + $0x20] sm:$0xff] %vm464_vm0, %v868_v24  ;;  %v913_v50 = vadd.f32 %v1656_v49, %v1496_v48 }
 0x222   : > { %v907_v63 = vpop.f32.mrf.mxu1 }
 0x223   : > { %1252 = vst.msk [vmem:[%s2356_s27 + $0x68] sm:$0xff] %vm464_vm0, %v913_v50  ;;  %v908_v51 = vadd.f32 %v1496_v48, %v907_v63 }
 0x224   : > { %v1647_v1 = vpop.f32.mrf.mxu0 }
 0x225   : > { %1251 = vst.msk [vmem:[%s2356_s27 + $0x60] sm:$0xff] %vm464_vm0, %v908_v51  ;;  %v883_v52 = vadd.f32 %v1647_v1, %v1496_v48 }
 0x226   : > { %v877_v10 = vpop.f32.mrf.mxu0 }
 0x227   : > { %1246 = vst.msk [vmem:[%s2356_s27 + $0x38] sm:$0xff] %vm464_vm0, %v883_v52  ;;  %v878_v29 = vadd.f32 %v1496_v48, %v877_v10 }
 0x228   : > { %v1659_v53 = vpop.f32.mrf.mxu1  ;;  %v1718_v36 = vpop.f32.mrf.mxu0 }
 0x229   : > { %1245 = vst.msk [vmem:[%s2356_s27 + $0x30] sm:$0xff] %vm464_vm0, %v878_v29  ;;  %v923_v57 = vadd.f32 %v1659_v53, %v1496_v48  ;;  %v1166_v58 = vadd.f32 %v1718_v36, %v2385_v28 }
 0x22a   : > { %v917_v59 = vpop.f32.mrf.mxu1  ;;  %v1160_v60 = vpop.f32.mrf.mxu0 }
 0x22b   : > { %1254 = vst.msk [vmem:[%s2356_s27 + $0x78] sm:$0xff] %vm464_vm0, %v923_v57  ;;  %1272 = vst.msk [vmem:[%s2393_s12 + $0x8] sm:$0xff] %vm464_vm0, %v1166_v58  ;;  %v918_v11 = vadd.f32 %v1496_v48, %v917_v59  ;;  %v1161_v61 = vadd.f32 %v2385_v28, %v1160_v60 }
 0x22c   : > { %v1678_v23 = vpop.f32.mrf.mxu1  ;;  %v1721_v2 = vpop.f32.mrf.mxu0 }
 0x22d   : > { %1253 = vst.msk [vmem:[%s2356_s27 + $0x70] sm:$0xff] %vm464_vm0, %v918_v11  ;;  %1271 = vst.msk [vmem:[%s2393_s12] sm:$0xff] %vm464_vm0, %v1161_v61  ;;  %v1176_v3 = vadd.f32 %v1721_v2, %v2385_v28 }
 0x22e   : > { %1256 = vst.msk [vmem:[%s2402_s20 + $0x8] sm:$0xff] %vm464_vm0, %v1678_v23  ;;  %v1000_v4 = vpop.f32.mrf.mxu1  ;;  %v1170_v5 = vpop.f32.mrf.mxu0 }
 0x22f   : > { %1274 = vst.msk [vmem:[%s2393_s12 + $0x18] sm:$0xff] %vm464_vm0, %v1176_v3  ;;  %1255 = vst.msk [vmem:[%s2402_s20] sm:$0xff] %vm464_vm0, %v1000_v4  ;;  %v1171_v6 = vadd.f32 %v2385_v28, %v1170_v5 }
 0x230   : > { %v1681_v7 = vpop.f32.mrf.mxu1  ;;  %v1724_v37 = vpop.f32.mrf.mxu0 }
 0x231   : > { %1273 = vst.msk [vmem:[%s2393_s12 + $0x10] sm:$0xff] %vm464_vm0, %v1171_v6  ;;  %1258 = vst.msk [vmem:[%s2402_s20 + $0x18] sm:$0xff] %vm464_vm0, %v1681_v7  ;;  %v1186_v8 = vadd.f32 %v1724_v37, %v2385_v28 }
 0x232   : > { %v1010_v17 = vpop.f32.mrf.mxu1  ;;  %v1180_v9 = vpop.f32.mrf.mxu0 }
 0x233   : > { %1276 = vst.msk [vmem:[%s2393_s12 + $0x28] sm:$0xff] %vm464_vm0, %v1186_v8  ;;  %1257 = vst.msk [vmem:[%s2402_s20 + $0x10] sm:$0xff] %vm464_vm0, %v1010_v17  ;;  %v1181_v35 = vadd.f32 %v2385_v28, %v1180_v9 }
 0x234   : > { %v1684_v13 = vpop.f32.mrf.mxu1  ;;  %v1727_v14 = vpop.f32.mrf.mxu0 }
 0x235   : > { %1275 = vst.msk [vmem:[%s2393_s12 + $0x20] sm:$0xff] %vm464_vm0, %v1181_v35  ;;  %1260 = vst.msk [vmem:[%s2402_s20 + $0x28] sm:$0xff] %vm464_vm0, %v1684_v13  ;;  %v1196_v15 = vadd.f32 %v1727_v14, %v2385_v28 }
 0x236   : > { %v1020_v18 = vpop.f32.mrf.mxu1  ;;  %v1190_v19 = vpop.f32.mrf.mxu0 }
 0x237   : > { %1278 = vst.msk [vmem:[%s2393_s12 + $0x38] sm:$0xff] %vm464_vm0, %v1196_v15  ;;  %1259 = vst.msk [vmem:[%s2402_s20 + $0x20] sm:$0xff] %vm464_vm0, %v1020_v18  ;;  %v1191_v45 = vadd.f32 %v2385_v28, %v1190_v19 }
 0x238   : > { %v1687_v22 = vpop.f32.mrf.mxu1  ;;  %v1730_v54 = vpop.f32.mrf.mxu0 }
 0x239   : > { %1277 = vst.msk [vmem:[%s2393_s12 + $0x30] sm:$0xff] %vm464_vm0, %v1191_v45  ;;  %1262 = vst.msk [vmem:[%s2402_s20 + $0x38] sm:$0xff] %vm464_vm0, %v1687_v22  ;;  %v1206_v21 = vadd.f32 %v1730_v54, %v2385_v28 }
 0x23a   : > { %v1030_v16 = vpop.f32.mrf.mxu1  ;;  %v1200_v47 = vpop.f32.mrf.mxu0 }
 0x23b   : > { %1280 = vst.msk [vmem:[%s2393_s12 + $0x48] sm:$0xff] %vm464_vm0, %v1206_v21  ;;  %1261 = vst.msk [vmem:[%s2402_s20 + $0x30] sm:$0xff] %vm464_vm0, %v1030_v16  ;;  %v1201_v26 = vadd.f32 %v2385_v28, %v1200_v47 }
 0x23c   : > { %v1690_v27 = vpop.f32.mrf.mxu1  ;;  %v1733_v31 = vpop.f32.mrf.mxu0 }
 0x23d   : > { %1279 = vst.msk [vmem:[%s2393_s12 + $0x40] sm:$0xff] %vm464_vm0, %v1201_v26  ;;  %1264 = vst.msk [vmem:[%s2402_s20 + $0x48] sm:$0xff] %vm464_vm0, %v1690_v27  ;;  %v1216_v48 = vadd.f32 %v1733_v31, %v2385_v28 }
 0x23e   : > { %v1040_v40 = vpop.f32.mrf.mxu1  ;;  %v1210_v25 = vpop.f32.mrf.mxu0 }
 0x23f   : > { %1282 = vst.msk [vmem:[%s2393_s12 + $0x58] sm:$0xff] %vm464_vm0, %v1216_v48  ;;  %1263 = vst.msk [vmem:[%s2402_s20 + $0x40] sm:$0xff] %vm464_vm0, %v1040_v40  ;;  %v1211_v56 = vadd.f32 %v2385_v28, %v1210_v25 }
 0x240   : > { %v1693_v44 = vpop.f32.mrf.mxu1  ;;  %v1736_v12 = vpop.f32.mrf.mxu0 }
 0x241   : > { %1281 = vst.msk [vmem:[%s2393_s12 + $0x50] sm:$0xff] %vm464_vm0, %v1211_v56  ;;  %1266 = vst.msk [vmem:[%s2402_s20 + $0x58] sm:$0xff] %vm464_vm0, %v1693_v44  ;;  %v1226_v30 = vadd.f32 %v1736_v12, %v2385_v28 }
 0x242   : > { %v1050_v32 = vpop.f32.mrf.mxu1  ;;  %v1220_v33 = vpop.f32.mrf.mxu0 }
 0x243   : > { %1284 = vst.msk [vmem:[%s2393_s12 + $0x68] sm:$0xff] %vm464_vm0, %v1226_v30  ;;  %1265 = vst.msk [vmem:[%s2402_s20 + $0x50] sm:$0xff] %vm464_vm0, %v1050_v32  ;;  %v1221_v34 = vadd.f32 %v2385_v28, %v1220_v33 }
 0x244   : > { %v1696_v62 = vpop.f32.mrf.mxu1  ;;  %v1739_v20 = vpop.f32.mrf.mxu0 }
 0x245   : > { %1283 = vst.msk [vmem:[%s2393_s12 + $0x60] sm:$0xff] %vm464_vm0, %v1221_v34  ;;  %1268 = vst.msk [vmem:[%s2402_s20 + $0x68] sm:$0xff] %vm464_vm0, %v1696_v62  ;;  %v1236_v38 = vadd.f32 %v1739_v20, %v2385_v28 }
 0x246   : > { %v1060_v55 = vpop.f32.mrf.mxu1  ;;  %v1230_v39 = vpop.f32.mrf.mxu0 }
 0x247   : > { %1286 = vst.msk [vmem:[%s2393_s12 + $0x78] sm:$0xff] %vm464_vm0, %v1236_v38  ;;  %1267 = vst.msk [vmem:[%s2402_s20 + $0x60] sm:$0xff] %vm464_vm0, %v1060_v55  ;;  %v1231_v0 = vadd.f32 %v2385_v28, %v1230_v39 }
 0x248   : > { %v1699_v41 = vpop.f32.mrf.mxu1 }
 0x249   : > { %1285 = vst.msk [vmem:[%s2393_s12 + $0x70] sm:$0xff] %vm464_vm0, %v1231_v0  ;;  %1270 = vst.msk [vmem:[%s2402_s20 + $0x78] sm:$0xff] %vm464_vm0, %v1699_v41 }
 0x24a   : > { %v1070_v42 = vpop.f32.mrf.mxu1 }
 0x24b   : > { %1269 = vst.msk [vmem:[%s2402_s20 + $0x70] sm:$0xff] %vm464_vm0, %v1070_v42 }
 0x24c PF: > { %s21_s17 = sadd.s32 1, %s1866_s17   ;;  %s2513_s13 = smov %s1858_s15 }
 0x24d   : > { %p18_p7 = scmp.ge.s32.totalorder %s21_s17, 6   ;;  %s2514_s14 = smov %s1862_s16 }
 0x24e   : > { %s2515_s15 = smov %s2518_s18  ;;  %s2516_s16 = smov %s2522_s19 }
 0x24f   :  { %20 = sbr.rel (!%p18_p7) target bundleno = 3 (0x3), region = 106 }

</bundles_post_ra>
